<compile_context>
chip_gen: v5e
topology: v5e:2x2
jax: 0.10.0
libtpu: 0.0.40
codegen_flags: <defaults>
</compile_context>

<pallas_src>
import jax
import jax.numpy as jnp
from jax.experimental import pallas as pl
from jax.experimental.pallas import tpu as pltpu

_LANE = 128
_SUBLANE = 8


def _round_up(x, m):
    return ((x + m - 1) // m) * m


def _vmem_capacity_bytes():
    try:
        return int(pltpu.get_tpu_info().vmem_capacity_bytes)
    except Exception:
        return 64 << 20   # conservative fallback (v7x physical per-core VMEM)


def _backbone_kernel(p_ref, w_ref, b_ref, pf_ref, avg_ref):
    """Conv-as-matmul + bias + ReLU + 7x7 mean for one packed batch tile.

    p_ref   : (bt*HW_pad, K)   bf16  im2col patches, HW zero-padded to 8-mult
    w_ref   : (K, C_pad)       bf16  flattened conv weight (resident block)
    b_ref   : (1, C_pad)       f32   conv bias (resident block)
    pf_ref  : (bt, HW, C_pad)  bf16  patch features (lane-dense C_pad)
    avg_ref : (bt, 1, C_pad)   f32   spatial mean == AvgPool2d(7) output
    """
    bt, hw, c_pad = pf_ref.shape
    hw_pad = p_ref.shape[0] // bt
    # One 8-aligned 2D MXU matmul with f32 accumulation (no per-batch raggedness).
    y = jnp.dot(p_ref[...], w_ref[...], preferred_element_type=jnp.float32)
    y = jnp.maximum(y + b_ref[...], 0.0)             # bias + ReLU in f32 (VPU)
    y = y.reshape(bt, hw_pad, c_pad)                 # layout-preserving (hw_pad % 8 == 0)
    y = y[:, :hw, :]                                 # drop zero-padded spatial rows
    pf_ref[...] = y.astype(pf_ref.dtype)             # bf16 store: halved HBM writeback
    avg_ref[...] = jnp.mean(y, axis=1, keepdims=True)  # in-kernel mean from f32 acc


def _pick_batch_tile(B, HW, HW_pad, K, C_pad, vmem_budget):
    """Largest bt whose per-step footprint (double-buffered blocks + in-kernel
    f32 accumulator) fits `vmem_budget`; clamped so the grid keeps >=2 steps
    (v7x dual-TC); prefers a divisor of B (no batch padding / slice copy)."""
    per_elem = (2 * HW_pad * K * 2          # patches block, x2 buffers, bf16
                + 2 * HW * C_pad * 2        # patch-feature block, x2 buffers, bf16
                + 2 * C_pad * 4             # avg block, x2 buffers, f32
                + HW_pad * C_pad * 4        # in-kernel f32 accumulator
                + HW * C_pad * 2)           # bf16 staging before store
    bt = max(1, int(vmem_budget) // per_elem)
    bt = min(bt, B)
    if B >= 2:
        bt = min(bt, -(-B // 2))            # >=2 grid steps for the 2 TCs on v7x
    for d in range(bt, 0, -1):              # prefer bt | B
        if B % d == 0:
            if d >= max(1, bt // 2):
                return d
            break
    return bt


def visual_extractor_forward(images, weight, bias, *, bt=None):
    """images: (B, C_in, H, W) NCHW; synthetic Conv2d(k=2, s=2) + ReLU backbone.

    Returns (patch_feats (B, HW, C_feat) bf16, avg_feats (B, C_feat) f32).
    """
    B, C_in, H, W = images.shape
    kh = kw = 2
    Ho, Wo = H // kh, W // kw
    HW = Ho * Wo
    HW_pad = _round_up(HW, _SUBLANE)
    K = kh * kw * C_in
    C_feat = weight.shape[-1]
    C_pad = _round_up(C_feat, _LANE)        # lane-dense output stores

    # --- glue: im2col in plain JAX (layout plumbing, ~1-2% of total bytes) ---
    # TODO(synk): fold the 2x2/stride-2 patch gather into the kernel (NHWC
    # image block + strided reads) so `patches` never round-trips HBM.
    x = images.reshape(B, C_in, Ho, kh, Wo, kw)
    x = jnp.transpose(x, (0, 2, 4, 3, 5, 1))          # (B, Ho, Wo, kh, kw, C_in)
    patches = x.reshape(B, HW, K).astype(jnp.bfloat16)

    w = weight.astype(jnp.bfloat16)
    b = jnp.reshape(bias, (1, C_feat)).astype(jnp.float32)
    if C_pad != C_feat:
        w = jnp.pad(w, ((0, 0), (0, C_pad - C_feat)))
        b = jnp.pad(b, ((0, 0), (0, C_pad - C_feat)))

    vmem_cap = _vmem_capacity_bytes()
    if bt is None:
        bt = _pick_batch_tile(B, HW, HW_pad, K, C_pad, vmem_cap // 4)
    bt = max(1, min(int(bt), B))
    Bp = _round_up(B, bt)

    # Pad batch (only if bt does not divide B) and spatial rows (49 -> 56) with
    # zero patches; 8-aligned rows keep every in-kernel reshape layout-preserving.
    patches = jnp.pad(patches, ((0, Bp - B), (0, HW_pad - HW), (0, 0)))
    patches2d = patches.reshape(Bp * HW_pad, K)       # free (contiguous) reshape

    cost = pl.CostEstimate(
        flops=2 * Bp * HW_pad * K * C_pad,
        transcendentals=0,
        bytes_accessed=(Bp * HW_pad * K * 2      # patches (bf16)
                        + K * C_pad * 2          # weight (resident)
                        + C_pad * 4              # bias
                        + Bp * HW * C_pad * 2    # patch feats out (bf16)
                        + Bp * C_pad * 4),       # avg feats out (f32)
    )

    # TODO(synk): at real scale (C_feat=2048) add a second "parallel" grid axis
    # over C_pad (lane tile 512-1024) and index w/b/outputs by it.
    pf, avg = pl.pallas_call(
        _backbone_kernel,
        out_shape=(
            jax.ShapeDtypeStruct((Bp, HW, C_pad), jnp.bfloat16),
            jax.ShapeDtypeStruct((Bp, 1, C_pad), jnp.float32),
        ),
        grid_spec=pltpu.PrefetchScalarGridSpec(
            num_scalar_prefetch=0,
            grid=(Bp // bt,),
            in_specs=[
                pl.BlockSpec((bt * HW_pad, K), lambda g: (g, 0)),
                pl.BlockSpec((K, C_pad), lambda g: (0, 0)),      # resident
                pl.BlockSpec((1, C_pad), lambda g: (0, 0)),      # resident
            ],
            out_specs=[
                pl.BlockSpec((bt, HW, C_pad), lambda g: (g, 0, 0)),
                pl.BlockSpec((bt, 1, C_pad), lambda g: (g, 0, 0)),
            ],
        ),
        compiler_params=pltpu.CompilerParams(
            dimension_semantics=("parallel",),     # 2-TC split on v7x
            vmem_limit_bytes=int(min(vmem_cap, 128 << 20) * 3 // 4),
        ),
        cost_estimate=cost,
    )(patches2d, w, b)

    # These slices are no-ops when bt | B and C_feat % 128 == 0 (real C=2048).
    patch_feats = pf[:B, :, :C_feat]
    avg_feats = avg.reshape(Bp, C_pad)[:B, :C_feat]
    return patch_feats, avg_feats


def _reference_forward(images, weight, bias):
    """Pure-JAX reference with the kernel's numerics (bf16 in, f32 accum)."""
    B, C_in, H, W = images.shape
    kh = kw = 2
    Ho, Wo = H // kh, W // kw
    x = images.reshape(B, C_in, Ho, kh, Wo, kw)
    x = jnp.transpose(x, (0, 2, 4, 3, 5, 1)).reshape(B, Ho * Wo, kh * kw * C_in)
    y = jnp.einsum("bpk,kc->bpc",
                   x.astype(jnp.bfloat16), weight.astype(jnp.bfloat16),
                   preferred_element_type=jnp.float32)
    y = jnp.maximum(y + jnp.reshape(bias, (1, 1, -1)).astype(jnp.float32), 0.0)
    return y, jnp.mean(y, axis=1)


if __name__ == "__main__":
    key = jax.random.PRNGKey(0)
    k_img, k_w, k_b = jax.random.split(key, 3)

    # Small shapes: batch=6, 3 input channels, 14x14 images -> 7x7 feature map
    # (the module's AvgPool2d(7) expects a 7x7 map); 128 feature channels so
    # the output is lane-dense with no post-kernel slice copy (real module:
    # 2048, also a multiple of 128).  The picker selects bt=3 -> 2 grid steps.
    B, C_in, H, W = 6, 3, 14, 14
    C_feat = 128
    K = 2 * 2 * C_in

    images = jax.random.normal(k_img, (B, C_in, H, W), dtype=jnp.float32)
    weight = (jax.random.normal(k_w, (K, C_feat), dtype=jnp.float32)
              * (1.0 / jnp.sqrt(K)))
    bias = jax.random.normal(k_b, (C_feat,), dtype=jnp.float32) * 0.01

    patch_feats, avg_feats = visual_extractor_forward(images, weight, bias)
    jax.block_until_ready((patch_feats, avg_feats))

    ref_pf, ref_avg = _reference_forward(images, weight, bias)
    assert patch_feats.shape == (B, 49, C_feat), patch_feats.shape
    assert avg_feats.shape == (B, C_feat), avg_feats.shape
    assert patch_feats.dtype == jnp.bfloat16
    # patch_feats are stored as bf16 (halved HBM writeback) -> relaxed tol.
    assert jnp.allclose(patch_feats.astype(jnp.float32), ref_pf,
                        atol=2e-2, rtol=2e-2)
    # avg_feats are computed in-kernel from the f32 accumulator -> tight tol.
    assert jnp.allclose(avg_feats, ref_avg, atol=1e-4, rtol=1e-4)

    print("KERNEL_OK")
</pallas_src>

<mosaic_0001>
module attributes {stable_mosaic.version = 11 : i64} {
  func.func @_backbone_kernel(%arg0: i32, %arg1: memref<168x12xbf16, #tpu.memory_space<vmem>>, %arg2: memref<12x128xbf16, #tpu.memory_space<vmem>>, %arg3: memref<1x128xf32, #tpu.memory_space<vmem>>, %arg4: memref<3x49x128xbf16, #tpu.memory_space<vmem>>, %arg5: memref<3x1x128xf32, #tpu.memory_space<vmem>>) attributes {dimension_semantics = [#tpu.dimension_semantics<parallel>], iteration_bounds = array<i64: 2>, scalar_prefetch = 0 : i64, scratch_operands = 0 : i64, tpu.core_type = #tpu.core_type<tc>, window_params = [{transform_indices = @transform_0, window_bounds = array<i64: 168, 12>}, {pipeline_mode = #tpu.pipeline_mode<synchronous>, transform_indices = @transform_1, window_bounds = array<i64: 12, 128>}, {pipeline_mode = #tpu.pipeline_mode<synchronous>, transform_indices = @transform_2, window_bounds = array<i64: 1, 128>}, {transform_indices = @transform_3, window_bounds = array<i64: 3, 49, 128>}, {transform_indices = @transform_4, window_bounds = array<i64: 3, 1, 128>}]} {
    %c0 = arith.constant 0 : index
    %c0_0 = arith.constant 0 : index
    %0 = vector.load %arg1[%c0, %c0_0] : memref<168x12xbf16, #tpu.memory_space<vmem>>, vector<168x12xbf16>
    %c0_1 = arith.constant 0 : index
    %c0_2 = arith.constant 0 : index
    %1 = vector.load %arg2[%c0_1, %c0_2] : memref<12x128xbf16, #tpu.memory_space<vmem>>, vector<12x128xbf16>
    %cst = arith.constant dense<0.000000e+00> : vector<168x128xf32>
    %2 = tpu.matmul %0, %1, %cst {dimension_numbers = #tpu.dot_dimension_numbers<[1], [0], [0], [1], [0, 0, 1, 1], [], []>} : vector<168x12xbf16>, vector<12x128xbf16>, vector<168x128xf32> -> vector<168x128xf32>
    %c0_3 = arith.constant 0 : index
    %c0_4 = arith.constant 0 : index
    %3 = vector.load %arg3[%c0_3, %c0_4] : memref<1x128xf32, #tpu.memory_space<vmem>>, vector<1x128xf32>
    %4 = vector.broadcast %3 : vector<1x128xf32> to vector<168x128xf32>
    %5 = arith.addf %2, %4 : vector<168x128xf32>
    %cst_5 = arith.constant 0.000000e+00 : f32
    %6 = vector.broadcast %cst_5 : f32 to vector<168x128xf32>
    %7 = arith.maximumf %5, %6 : vector<168x128xf32>
    %8 = vector.shape_cast %7 : vector<168x128xf32> to vector<3x56x128xf32>
    %9 = vector.extract_strided_slice %8 {offsets = [0, 0, 0], sizes = [3, 49, 128], strides = [1, 1, 1]} : vector<3x56x128xf32> to vector<3x49x128xf32>
    %10 = arith.truncf %9 : vector<3x49x128xf32> to vector<3x49x128xbf16>
    %c0_6 = arith.constant 0 : index
    %c0_7 = arith.constant 0 : index
    %c0_8 = arith.constant 0 : index
    %11 = vector.load %arg4[%c0_6, %c0_7, %c0_8] : memref<3x49x128xbf16, #tpu.memory_space<vmem>>, vector<3x49x128xbf16>
    tpu.vector_store %arg4[%c0_6, %c0_7, %c0_8], %10 {strides = array<i32>} : memref<3x49x128xbf16, #tpu.memory_space<vmem>>, vector<3x49x128xbf16>,
    %cst_9 = arith.constant dense<0.000000e+00> : vector<3x128xf32>
    %12 = vector.multi_reduction <add>, %9, %cst_9 [1] : vector<3x49x128xf32> to vector<3x128xf32>
    %13 = vector.shape_cast %12 : vector<3x128xf32> to vector<3x1x128xf32>
    %cst_10 = arith.constant 4.900000e+01 : f32
    %14 = vector.broadcast %cst_10 : f32 to vector<3x1x128xf32>
    %15 = arith.divf %13, %14 : vector<3x1x128xf32>
    %c0_11 = arith.constant 0 : index
    %c0_12 = arith.constant 0 : index
    %c0_13 = arith.constant 0 : index
    %16 = vector.load %arg5[%c0_11, %c0_12, %c0_13] : memref<3x1x128xf32, #tpu.memory_space<vmem>>, vector<3x1x128xf32>
    tpu.vector_store %arg5[%c0_11, %c0_12, %c0_13], %15 {strides = array<i32>} : memref<3x1x128xf32, #tpu.memory_space<vmem>>, vector<3x1x128xf32>,
    return
  }
  func.func @transform_0(%arg0: i32) -> (i32, i32) {
    %c0_i32 = arith.constant 0 : i32
    %c0_i32_0 = arith.constant 0 : i32
    return %arg0, %c0_i32 : i32, i32
  }
  func.func @transform_1(%arg0: i32) -> (i32, i32) {
    %c0_i32 = arith.constant 0 : i32
    %c0_i32_0 = arith.constant 0 : i32
    %c0_i32_1 = arith.constant 0 : i32
    return %c0_i32, %c0_i32_0 : i32, i32
  }
  func.func @transform_2(%arg0: i32) -> (i32, i32) {
    %c0_i32 = arith.constant 0 : i32
    %c0_i32_0 = arith.constant 0 : i32
    %c0_i32_1 = arith.constant 0 : i32
    return %c0_i32, %c0_i32_0 : i32, i32
  }
  func.func @transform_3(%arg0: i32) -> (i32, i32, i32) {
    %c0_i32 = arith.constant 0 : i32
    %c0_i32_0 = arith.constant 0 : i32
    %c0_i32_1 = arith.constant 0 : i32
    return %arg0, %c0_i32, %c0_i32_0 : i32, i32, i32
  }
  func.func @transform_4(%arg0: i32) -> (i32, i32, i32) {
    %c0_i32 = arith.constant 0 : i32
    %c0_i32_0 = arith.constant 0 : i32
    %c0_i32_1 = arith.constant 0 : i32
    return %arg0, %c0_i32, %c0_i32_0 : i32, i32, i32
  }
}

</mosaic_0001>

<bundles_post_ra>
// kernel: tpu_custom_call.1
= control target key start
LH: loop header
LB: loop body
LE: loop exit
PB: predicated region body
PF: predicated region fallthrough
CT: control target
= control target key end

     0   :  { %10 = vsyncpa [#allocation3], 0  ;;  %s1202_s0 = inlined_call_operand.vmem [shape: bf16[336,12], index: 0, kind: input, shape index: {}]   ;;  %s1203_s1 = inlined_call_operand.vmem [shape: bf16[12,128], index: 1, kind: input, shape index: {}]   ;;  %s1204_s2 = inlined_call_operand.vmem [shape: f32[1,128], index: 2, kind: input, shape index: {}]   ;;  %s1205_s3 = inlined_call_operand.hbm [shape: bf16[6,49,128], index: 3, kind: output, shape index: {0}]   ;;  %s1206_s4 = inlined_call_operand.hbm [shape: f32[6,1,128], index: 4, kind: output, shape index: {1}]  }
   0x1   :  { %12 = vsyncpa [#allocation3 + $0x1], 0 }
   0x2   :  { %13 = vsyncpa [#allocation5], 0 }
   0x3   :  { %15 = vsyncpa [#allocation5 + $0x1], 0  ;;  %s962_s15 = smov 0   ;;  %s964_s16 = smov 0  }
   0x4   :  { %s966_s17 = smov 0   ;;  %s968_s18 = smov 0  }
   0x5 LB: > { %s983_s19 = sadd.s32 4294967295, %s930_s18   ;;  %s656_s20 = sadd.s32 4294967294, %s930_s18   ;;  %s930_s18 = sphi %s968_s18, %s1214_s18   ;;  %s926_s17 = sphi %s966_s17, %s1213_s17   ;;  %s922_s16 = sphi %s964_s16, %s1212_s16   ;;  %s918_s15 = sphi %s962_s15, %s1211_s15  }
   0x6   : > { %s987_s21 = sadd.s32 1, %s930_s18   ;;  %s96_s22 = sadd.s32 1, %s926_s17 }
   0x7   : > { %s93_s23 = ssub.s32 %s930_s18, %s987_s21  ;;  %p106_p0 = scmp.ne.s32.totalorder %s926_s17, %s922_s16 }
   0x8   : > { %p94_p1 = scmp.eq.s32.totalorder %s93_s23, 0  ;;  %p107_p2 = scmp.eq.s32.totalorder %s983_s19, 1 }
   0x9   : > { %p112_p3 = scmp.ne.s32.totalorder %s922_s16, %s918_s15  ;;  %p113_p4 = scmp.eq.s32.totalorder %s656_s20, 1 }
   0xa   : > { %s998_s24 = scalar_select %p94_p1, %s926_s17, %s96_s22  }
   0xb   : > { %p1000_p5 = por %p107_p2, %p106_p0  ;;  %p1004_p6 = por %p113_p4, %p112_p3 }
   0xc   : > { %p659_p7 = scmp.ge.s32.totalorder %s930_s18, 1  ;;  %p172_p8 = scmp.lt.s32.totalorder %s930_s18, 3 }
   0xe   : > { %p173_p9 = pnand %p659_p7, %p172_p8 }
   0xf   : > { %s203_s5 = smul.u32 (!%p173_p9), 21, %s983_s19  ;;  %s1032_s10 = sand.u32 (!%p173_p9), 1, %s922_s16  }
  0x10   : > { %176 = sbr.rel (%p173_p9) target bundleno = 232 (0xe8), region = 32  ;;  %s524_s30 = scalar_lea.sflag (!%p173_p9), [#allocation3], %s1032_s10 }
  0x11   : > { %p204_p10 = scmp.lt.s32.totalorder (!%p173_p9), %s203_s5, 41  ;;  %s780_s11 = smul.u32 (!%p173_p9), 84, %s1032_s10 }
  0x12   : > { %s794_s20 = smul.u32 (!%p173_p9), 84, %s983_s19 }
  0x13   : > { %s1048_s14 = scalar_lea.vmem (!%p173_p9), [#allocation2], %s780_s11 }
  0x14   : > { %s541_s27 = scalar_lea.hbm (!%p173_p9), %s1205_s3, %s794_s20  ;;  %s542_s28 = sshll.u32 (!%p173_p9), %s1048_s14, 4  ;;  %s1139_s28 = int_to_ptr.vmem [resolvable:$true] %s542_s28 }
  0x15   : > { %v703_v0 = vld [vmem:[%s1203_s1] sm:$0xf]  ;;  %v729_v1 = vld [vmem:[%s1203_s1] sm:$0x30]  ;;  %vm331_vm0 = vcmask 1045504   ;;  %s1216_s5 = smov (!%p204_p10, %s203_s5), 41 }
  0x16   : > { %v704_v2 = vor.u32 %v729_v1, %v703_v0  ;;  %s660_s6 = sshll.u32 %s1216_s5, 2  ;;  %vm297_vm1 = vcmask 97280   ;;  %v1038_v17 = vld [vmem:[%s1204_s2] ss:$0 sm:$0xff]  ;;  %vm446_vm2 = vcmask 1040384   ;;  %s544_s29 = sshll.u32 %s541_s27, 4  ;;  %s1141_s29 = int_to_ptr.hbm [resolvable:$true] %s544_s29 }
  0x17   : > { %s207_s9 = scalar_lea.vmem %s1202_s0, %s660_s6  ;;  %vm447_vm3 = vsmask.f32 256  ;;  %v449_v23 = vld [vmem:[%s1048_s14 + $0x18] sm:$0x1]  ;;  %v458_v50 = vld [vmem:[%s1048_s14 + $0x34] sm:$0x1] }
  0x18   : > { %v333_v3 = vsel %vm331_vm0, %v704_v2, 0  ;;  %v719_v4 = vld [vmem:[%s207_s9] sm:$0xff]  ;;  %v722_v5 = vld [vmem:[%s207_s9 + $0x18] sm:$0xff]  ;;  %v725_v6 = vld [vmem:[%s207_s9 + $0x30] sm:$0xff]  ;;  %s850_s5 = sshra.s32 %s1141_s29, 4  ;;  %s851_s5 = int_to_ptr.hbm [resolvable:$true] %s850_s5 }
  0x19   : > { %342 = vmatpush.bf16.msra.mxu0 %v333_v3  ;;  %777 = vmatpush.bf16.msra.mxu1 %v333_v3  ;;  %v728_v7 = vld [vmem:[%s207_s9 + $0x48] sm:$0xff]  ;;  %v232_v8 = vld [vmem:[%s207_s9 + $0x50] sm:$0xf]  ;;  %v723_v11 = vld [vmem:[%s207_s9 + $0x20] sm:$0xff]  ;;  %s852_s6 = scalar_lea.hbm %s851_s5, 84  ;;  %p857_p0 = scmp.lt.s32.totalorder %s851_s5, %s1205_s3 }
  0x1a   : > { %778 = vmatpush.bf16.msra.mxu2 %v333_v3  ;;  %779 = vmatpush.bf16.msra.mxu3 %v333_v3  ;;  %v280_v9 = vunpack.c.l.b16 %v232_v8  ;;  %v720_v10 = vld [vmem:[%s207_s9 + $0x8] sm:$0xff]  ;;  %v726_v12 = vld [vmem:[%s207_s9 + $0x38] sm:$0xff]  ;;  %v721_v14 = vld [vmem:[%s207_s9 + $0x10] sm:$0xff]  ;;  %p853_p11 = scmp.ne.s32.totalorder %s851_s5, %s852_s6 }
  0x1b   : > { %v724_v15 = vld [vmem:[%s207_s9 + $0x28] sm:$0xff]  ;;  %v727_v16 = vld [vmem:[%s207_s9 + $0x40] sm:$0xff]  ;;  %vm1044_vm4 = vmand %vm446_vm2, %vm447_vm3  ;;  %s856_s9 = scalar_lea.hbm %s1205_s3, 168 }
  0x1c   : > { %705 = vmatmul.msk.bf16.vlgmr.msra.gmra.mxu0 %vm297_vm1, %v719_v4  ;;  %708 = vmatmul.msk.bf16.vlgmr.msra.gmra.mxu1 %vm297_vm1, %v722_v5  ;;  %v291_v13 = vpack.c.b16 %v280_v9, %v280_v9  ;;  %p854_p12 = pnand %p853_p11, %p1000_p5  ;;  %p858_p1 = scmp.lt.s32.totalorder %s856_s9, %s852_s6 }
  0x1d   : > { %711 = vmatmul.msk.bf16.vlgmr.msra.gmra.mxu2 %vm297_vm1, %v725_v6  ;;  %714 = vmatmul.msk.bf16.vlgmr.msra.gmra.mxu3 %vm297_vm1, %v728_v7  ;;  %v467_v7 = vld [vmem:[%s1048_s14 + $0x50] sm:$0x1] }
  0x1e   : > { %p855_p13 = pneg %p854_p12  ;;  %p859_p2 = por %p858_p1, %p857_p0 }
  0x20   : > { %p860_p3 = pnand %p859_p2, %p855_p13 }
  0x2c   : > { %706 = vmatmul.msk.bf16.gmra.mxu0 %vm297_vm1, %v720_v10  ;;  %709 = vmatmul.msk.bf16.gmra.mxu1 %vm297_vm1, %v723_v11 }
  0x2d   : > { %712 = vmatmul.msk.bf16.gmra.mxu2 %vm297_vm1, %v726_v12  ;;  %715 = vmatmul.msk.bf16.gmra.mxu3 %vm297_vm1, %v291_v13 }
  0x3c   : > { %707 = vmatmul.msk.bf16.gmra.mxu0 %vm297_vm1, %v721_v14  ;;  %710 = vmatmul.msk.bf16.gmra.mxu1 %vm297_vm1, %v724_v15  ;;  %v932_v15 = vmov 49.0  }
  0x3d   : > { %713 = vmatmul.msk.bf16.gmra.mxu2 %vm297_vm1, %v727_v16  ;;  %834 = vrcp.f32 %v932_v15 }
  0x99   : > { %v344_v18 = vpop.f32.mrf.mxu0  ;;  %v359_v19 = vpop.f32.mrf.mxu1 }
  0x9a   : > { %v360_v20 = vadd.f32 %v1038_v17, %v359_v19  ;;  %v1052_v24 = vadd.f32 %v1038_v17, %v344_v18 }
  0x9c   : > { %v1041_v21 = vmax.f32 %v360_v20, 0.0  ;;  %v398_v31 = vmax.f32 %v1052_v24, 0.0 }
  0x9e   : > { %v425_v25 = vpack.c.bf16 %v1041_v21, %v1041_v21 }
  0xa0   : > { %v450_v26 = vsel %vm1044_vm4, %v425_v25, %v449_v23  ;;  %v374_v27 = vpop.f32.mrf.mxu2  ;;  %v389_v34 = vpop.f32.mrf.mxu3 }
  0xa1   : > { %451 = vst [vmem:[%s1048_s14 + $0x18] sm:$0x1] %v450_v26  ;;  %v375_v28 = vadd.f32 %v1038_v17, %v374_v27  ;;  %v346_v29 = vpop.f32.mrf.mxu0  ;;  %v361_v30 = vpop.f32.mrf.mxu1  ;;  %v1074_v41 = vadd.f32 %v1038_v17, %v389_v34 }
  0xa2   : > { %v1062_v32 = vadd.f32 %v1038_v17, %v346_v29  ;;  %v362_v33 = vadd.f32 %v1038_v17, %v361_v30  ;;  %v1119_v27 = vpop.eup %834 }
  0xa3   : > { %v1065_v35 = vmax.f32 %v375_v28, 0.0  ;;  %v416_v48 = vmax.f32 %v1074_v41, 0.0  ;;  %vm515_vm5 = vweird.f32 %v1119_v27 }
  0xa4   : > { %v399_v36 = vmax.f32 %v1062_v32, 0.0  ;;  %v405_v37 = vmax.f32 %v362_v33, 0.0 }
  0xa5   : > { %v431_v38 = vpack.c.bf16 %v1065_v35, %v1065_v35 }
  0xa6   : > { %v733_v39 = vpack.c.bf16 %v399_v36, %v398_v31  ;;  %v426_v40 = vpack.c.bf16 %v405_v37, %v405_v37  ;;  %v470_v26 = vadd.f32 %v399_v36, %v398_v31  ;;  %v511_v31 = vmul.f32 49.0, %v1119_v27 }
  0xa7   : > { %457 = vst [vmem:[%s1048_s14 + $0x30] sm:$0xf] %v431_v38 }
  0xa8   : > { %734 = vst [vmem:[%s1048_s14] sm:$0xff] %v733_v39   ;;  %v376_v42 = vpop.f32.mrf.mxu2  ;;  %v391_v46 = vpop.f32.mrf.mxu3 }
  0xa9   : > { %452 = vst [vmem:[%s1048_s14 + $0x1c] sm:$0xf] %v426_v40  ;;  %v377_v43 = vadd.f32 %v1038_v17, %v376_v42  ;;  %v349_v44 = vpop.f32.mrf.mxu0  ;;  %v364_v45 = vpop.f32.mrf.mxu1  ;;  %v1083_v49 = vadd.f32 %v1038_v17, %v391_v46 }
  0xaa   : > { %v350_v55 = vadd.f32 %v1038_v17, %v349_v44  ;;  %v365_v56 = vadd.f32 %v1038_v17, %v364_v45 }
  0xab   : > { %v1079_v47 = vmax.f32 %v377_v43, 0.0  ;;  %v417_v52 = vmax.f32 %v1083_v49, 0.0 }
  0xac   : > { %v400_v0 = vmax.f32 %v350_v55, 0.0  ;;  %v406_v1 = vmax.f32 %v365_v56, 0.0  ;;  %v512_v55 = vsub.f32 1.0, %v511_v31 }
  0xad   : > { %v432_v51 = vpack.c.bf16 %v1079_v47, %v1079_v47  ;;  %v768_v54 = vpack.c.bf16 %v417_v52, %v416_v48 }
  0xae   : > { %v471_v22 = vadd.f32 %v470_v26, %v400_v0  ;;  %v484_v28 = vadd.f32 %v406_v1, %v405_v37 }
  0xaf   : > { %v459_v53 = vsel %vm1044_vm4, %v432_v51, %v458_v50  ;;  %776 = vst [vmem:[%s1048_s14 + $0x48] sm:$0xff] %v768_v54  }
  0xb0   : > { %460 = vst [vmem:[%s1048_s14 + $0x34] sm:$0x1] %v459_v53  ;;  %v379_v57 = vpop.f32.mrf.mxu2  ;;  %v394_v62 = vpop.f32.mrf.mxu3  ;;  %v476_v53 = vsel %vm446_vm2, %v1041_v21, 0.0 }
  0xb1   : > { %v351_v58 = vpop.f32.mrf.mxu0  ;;  %v366_v59 = vpop.f32.mrf.mxu1  ;;  %v395_v63 = vadd.f32 %v1038_v17, %v394_v62  ;;  %v380_v8 = vadd.f32 %v1038_v17, %v379_v57 }
  0xb2   : > { %v352_v60 = vadd.f32 %v1038_v17, %v351_v58  ;;  %v367_v61 = vadd.f32 %v1038_v17, %v366_v59  ;;  %v489_v59 = vsel %vm446_vm2, %v1079_v47, 0.0 }
  0xb3   : > { %v1102_v4 = vmax.f32 %v395_v63, 0.0  ;;  %v412_v18 = vmax.f32 %v380_v8, 0.0 }
  0xb4   : > { %v401_v2 = vmax.f32 %v352_v60, 0.0  ;;  %v407_v3 = vmax.f32 %v367_v61, 0.0 }
  0xb5   : > { %v439_v9 = vpack.c.bf16 %v1102_v4, %v1102_v4 }
  0xb6   : > { %v738_v5 = vpack.c.bf16 %v401_v2, %v400_v0  ;;  %v748_v6 = vpack.c.bf16 %v407_v3, %v406_v1  ;;  %v472_v38 = vadd.f32 %v471_v22, %v401_v2  ;;  %v485_v39 = vadd.f32 %v484_v28, %v407_v3 }
  0xb7   : > { %v468_v14 = vsel %vm1044_vm4, %v439_v9, %v467_v7  ;;  %v513_v0 = vmul.f32 %v1119_v27, %v512_v55 }
  0xb8   : > { %770 = vst [vmem:[%s1048_s14 + $0x8] sm:$0xff] %v738_v5   ;;  %v381_v10 = vpop.f32.mrf.mxu2  ;;  %v396_v16 = vpop.f32.mrf.mxu3 }
  0xb9   : > { %772 = vst [vmem:[%s1048_s14 + $0x20] sm:$0xff] %v748_v6   ;;  %v382_v11 = vadd.f32 %v1038_v17, %v381_v10  ;;  %v354_v12 = vpop.f32.mrf.mxu0  ;;  %v369_v13 = vpop.f32.mrf.mxu1  ;;  %v514_v6 = vadd.f32 %v1119_v27, %v513_v0  ;;  %v502_v10 = vsel %vm446_vm2, %v1102_v4, 0.0 }
  0xba   : > { %469 = vst [vmem:[%s1048_s14 + $0x50] sm:$0x1] %v468_v14  ;;  %v355_v20 = vadd.f32 %v1038_v17, %v354_v12  ;;  %v370_v23 = vadd.f32 %v1038_v17, %v369_v13 }
  0xbb   : > { %v413_v19 = vmax.f32 %v382_v11, 0.0 }
  0xbc   : > { %v402_v29 = vmax.f32 %v355_v20, 0.0  ;;  %v408_v30 = vmax.f32 %v370_v23, 0.0 }
  0xbd   : > { %v758_v25 = vpack.c.bf16 %v413_v19, %v412_v18  ;;  %v497_v60 = vadd.f32 %v413_v19, %v412_v18 }
  0xbe   : > { %v473_v36 = vadd.f32 %v472_v38, %v402_v29  ;;  %v486_v43 = vadd.f32 %v485_v39, %v408_v30 }
  0xbf   : > { %774 = vst [vmem:[%s1048_s14 + $0x38] sm:$0xff] %v758_v25  }
  0xc0   : > { %v384_v32 = vpop.f32.mrf.mxu2 }
  0xc1   : > { %v356_v33 = vpop.f32.mrf.mxu0  ;;  %v371_v34 = vpop.f32.mrf.mxu1  ;;  %v385_v24 = vadd.f32 %v1038_v17, %v384_v32 }
  0xc2   : > { %v357_v40 = vadd.f32 %v1038_v17, %v356_v33  ;;  %v372_v42 = vadd.f32 %v1038_v17, %v371_v34 }
  0xc3   : > { %v414_v54 = vmax.f32 %v385_v24, 0.0 }
  0xc4   : > { %v403_v37 = vmax.f32 %v357_v40, 0.0  ;;  %v409_v44 = vmax.f32 %v372_v42, 0.0 }
  0xc5   : > { %v498_v21 = vadd.f32 %v497_v60, %v414_v54 }
  0xc6   : > { %v743_v45 = vpack.c.bf16 %v403_v37, %v402_v29  ;;  %v474_v46 = vadd.f32 %v473_v36, %v403_v37  ;;  %v753_v50 = vpack.c.bf16 %v409_v44, %v408_v30  ;;  %v487_v51 = vadd.f32 %v486_v43, %v409_v44 }
  0xc8   : > { %771 = vst [vmem:[%s1048_s14 + $0x10] sm:$0xff] %v743_v45   ;;  %v477_v56 = vadd.f32 %v476_v53, %v474_v46  ;;  %v488_v57 = vadd.f32 %v487_v51, %v1065_v35  ;;  %v386_v58 = vpop.f32.mrf.mxu2 }
  0xc9   : > { %773 = vst [vmem:[%s1048_s14 + $0x28] sm:$0xff] %v753_v50   ;;  %v387_v61 = vadd.f32 %v1038_v17, %v386_v58 }
  0xca   : > { %v478_v62 = vrot.slane %v477_v56, 4  ;;  %v490_v63 = vadd.f32 %v489_v59, %v488_v57 }
  0xcb   : > { %v415_v1 = vmax.f32 %v387_v61, 0.0 }
  0xcc   : > { %v479_v2 = vadd.f32 %v478_v62, %v477_v56  ;;  %v491_v35 = vrot.slane %v490_v63, 4 }
  0xcd   : > { %v763_v47 = vpack.c.bf16 %v415_v1, %v414_v54  ;;  %v499_v17 = vadd.f32 %v498_v21, %v415_v1 }
  0xce   : > { %v480_v3 = vrot.slane %v479_v2, 2  ;;  %v492_v5 = vadd.f32 %v491_v35, %v490_v63 }
  0xcf   : > { %775 = vst [vmem:[%s1048_s14 + $0x40] sm:$0xff] %v763_v47   ;;  %v500_v7 = vadd.f32 %v499_v17, %v416_v48 }
  0xd0   : > { %v481_v8 = vadd.f32 %v480_v3, %v479_v2  ;;  %v493_v9 = vrot.slane %v492_v5, 2 }
  0xd1   : > { %863 = shalt.err (!%p860_p3)
}
  0xd2   : > { %s933_s13 = smov 64   ;;  %s934_s14 = smov 4   ;;  %v501_v41 = vadd.f32 %v500_v7, %v417_v52  ;;  %v482_v48 = vrot.slane %v481_v8, 1  ;;  %v494_v4 = vadd.f32 %v493_v9, %v492_v5  ;;  %v516_v11 = vsel %vm515_vm5, %v1119_v27, %v514_v6 }
  0xd3   : > { %783 = dma.vmem_to_hbm [thread:$0]  (%p1000_p5), %s1139_s28, 1344, %s1141_s29, %s524_s30, %s933_s13, %s933_s13, %s934_s14  }
  0xd4   : > { %s781_s20 = smul.u32 3, %s1032_s10  ;;  %v503_v12 = vadd.f32 %v502_v10, %v501_v41  ;;  %v483_v13 = vadd.f32 %v482_v48, %v481_v8  ;;  %v495_v14 = vrot.slane %v494_v4, 1  ;;  %s884_s11 = scalar_lea.hbm %s1206_s4, 6 }
  0xd5   : > { %s536_s22 = smul.u32 3, %s983_s19  ;;  %s529_s19 = scalar_lea.sflag [#allocation5], %s1032_s10 }
  0xd6   : > { %v504_v15 = vrot.slane %v503_v12, 4  ;;  %v517_v16 = vmul.f32 %v516_v11, %v483_v13  ;;  %v496_v18 = vadd.f32 %v495_v14, %v494_v4  ;;  %s202_s23 = scalar_lea.vmem [#allocation4], %s781_s20 }
  0xd7   : > { %s557_s29 = scalar_lea.hbm %s1206_s4, %s536_s22  ;;  %s558_s30 = sshll.u32 %s202_s23, 4  ;;  %s559_s30 = int_to_ptr.vmem [resolvable:$true] %s558_s30 }
  0xd8   : > { %v505_v19 = vadd.f32 %v504_v15, %v503_v12  ;;  %520 = vst [vmem:[%s202_s23] sm:$0x1] %v517_v16  ;;  %v518_v20 = vmul.f32 %v516_v11, %v496_v18  ;;  %s560_s5 = sshll.u32 %s557_s29, 4  ;;  %s561_s5 = int_to_ptr.hbm [resolvable:$true] %s560_s5 }
  0xd9   : > { %s878_s6 = sshra.s32 %s561_s5, 4  ;;  %s879_s6 = int_to_ptr.hbm [resolvable:$true] %s878_s6 }
  0xda   : > { %v506_v49 = vrot.slane %v505_v19, 2  ;;  %521 = vst [vmem:[%s202_s23 + $0x1] sm:$0x1] %v518_v20  ;;  %s880_s7 = scalar_lea.hbm %s879_s6, 3  ;;  %p885_p9 = scmp.lt.s32.totalorder %s879_s6, %s1206_s4 }
  0xdb   : > { %p881_p4 = scmp.ne.s32.totalorder %s879_s6, %s880_s7  ;;  %p886_p10 = scmp.lt.s32.totalorder %s884_s11, %s880_s7 }
  0xdc   : > { %v507_v52 = vadd.f32 %v506_v49, %v505_v19 }
  0xdd   : > { %p882_p7 = pnand %p881_p4, %p1000_p5  ;;  %p887_p11 = por %p886_p10, %p885_p9 }
  0xde   : > { %v508_v23 = vrot.slane %v507_v52, 1 }
  0xdf   : > { %p883_p8 = pneg %p882_p7 }
  0xe0   : > { %v509_v25 = vadd.f32 %v508_v23, %v507_v52 }
  0xe1   : > { %p888_p12 = pnand %p887_p11, %p883_p8 }
  0xe2   : > { %v519_v26 = vmul.f32 %v516_v11, %v509_v25 }
  0xe4   : > { %522 = vst [vmem:[%s202_s23 + $0x2] sm:$0x1] %v519_v26 }
  0xe5   : > { %891 = shalt.err (!%p888_p12)
}
  0xe6   : > { %s935_s10 = smov 16   ;;  %s936_s14 = smov 1  }
  0xe7   : > { %784 = dma.vmem_to_hbm [thread:$0]  (%p1000_p5), %s559_s30, 48, %s561_s5, %s529_s19, %s935_s10, %s935_s10, %s936_s14  }
  0xe8 PF: > { %p795_p13 = scmp.ge.s32.totalorder %s930_s18, 2  ;;  %s575_s20 = sand.u32 1, %s918_s15  }
  0xe9   : > { %s576_s22 = scalar_lea.sflag [#allocation3], %s575_s20 }
  0xea   : > { %p788_p0 = pnand %p795_p13, %p1004_p6 }
  0xec   : > { %p789_p1 = pneg %p788_p0 }
  0xee   : > { %909 = dma.done.wait (%p789_p1), %s576_s22, 1344  }
  0xef   : > { %911 = vsyncadd (%p789_p1), %s576_s22, 4294965952  ;;  %s586_s23 = scalar_lea.sflag [#allocation5], %s575_s20 }
  0xf0   : > { %913 = dma.done.wait (%p789_p1), %s586_s23, 48  }
  0xf1   : > { %915 = vsyncadd (%p789_p1), %s586_s23, 4294967248  ;;  %p18_p5 = scmp.ge.s32.totalorder %s987_s21, 4   ;;  %s1211_s15 = smov %s922_s16 }
  0xf2   : > { %s1212_s16 = smov %s926_s17  ;;  %s1213_s17 = smov %s998_s24 }
  0xf3   : > { %s1214_s18 = smov %s987_s21  ;;  %20 = sbr.rel (!%p18_p5) target bundleno = 5 (0x5), region = 84 }
  0xf8   :  { %592 = vsyncpa [#allocation3], 1 }
  0xf9   :  { %594 = vsyncpa [#allocation3 + $0x1], 1 }
  0xfa   :  { %595 = vsyncpa [#allocation5], 1 }
  0xfb   :  { %597 = vsyncpa [#allocation5 + $0x1], 1 }

</bundles_post_ra>
